<compile_context>
chip_gen: v7x
topology: tpu7x:2x2x1
jax: 0.10.0
libtpu: 0.0.40
codegen_flags: <defaults>
</compile_context>

<pallas_src>
import functools

import jax
import jax.numpy as jnp
from jax import lax
from jax.experimental import pallas as pl
from jax.experimental.pallas import tpu as pltpu

_LANE = 128
_SUBLANE = 8


def _combo_loss_kernel(pred_ref, mask_ref, out_ref, acc_ref, *,
                       alpha, beta, p, dice_alpha, dice_eps, binary_mask,
                       tile_rows, chunk_rows, d_valid, needs_mask):
    """Accumulate per-sample statistics over feature tiles and finalize.

    acc_ref: (n_stats, 8, 128) f32 VMEM scratch holding lane/sublane-resident
    partial sums.  Stats order: inter, pred^p, [mask^p], mask_sum, bce.
    mask^p is dropped (n_stats == 4) when p == 1 or binary_mask, since then
    mk^p == mk and mask_sum doubles as mask_pow.
    """
    k = pl.program_id(1)
    n_k = pl.num_programs(1)
    n_stats = acc_ref.shape[0]
    skip_maskp = n_stats == 4
    n_chunks = tile_rows // chunk_rows
    groups = chunk_rows // _SUBLANE

    @pl.when(k == 0)
    def _():
        acc_ref[...] = jnp.zeros_like(acc_ref)

    p_int = int(p) if float(p).is_integer() else None

    def powp(x):
        if p_int == 1:
            return x
        if p_int is not None:
            return lax.integer_pow(x, p_int)   # multiply chain, no EUP pow
        return x ** p                          # non-integer p fallback

    def tile_update(masked):
        """Chunked accumulation over this grid step's (tile_rows, 128) block."""
        def chunk_body(c, carry):
            r0 = pl.multiple_of(c * chunk_rows, chunk_rows)
            pr = pred_ref[0, pl.ds(r0, chunk_rows), :].astype(jnp.float32)
            mk = mask_ref[0, pl.ds(r0, chunk_rows), :].astype(jnp.float32)

            if masked:
                # Element-index mask for the ragged tail / block overhang.
                # jnp.where (select) so garbage overhang reads never propagate.
                rid = lax.broadcasted_iota(jnp.int32, (chunk_rows, _LANE), 0)
                lid = lax.broadcasted_iota(jnp.int32, (chunk_rows, _LANE), 1)
                idx = (k * tile_rows + r0) * _LANE + rid * _LANE + lid
                valid = idx < d_valid
                pr = jnp.where(valid, pr, 0.0)
                mk = jnp.where(valid, mk, 0.0)

            if binary_mask:
                # mask in {0,1}: single-log BCE, exactly equal to the two-term
                # form for hard masks.
                x = mk * pr + (1.0 - mk) * (1.0 - pr)
                w = beta * mk + (1.0 - beta) * (1.0 - mk)
                bce_el = -(w * jnp.log(x + 1e-14))
            else:
                # Refactored soft-mask BCE (saves the (1-mk) term and one mul).
                l1 = jnp.log(pr + 1e-14)
                l2 = jnp.log(1.0 - pr + 1e-14)
                cb = 1.0 - beta
                bce_el = -(mk * (beta * l1 - cb * l2) + cb * l2)
            if masked:
                bce_el = jnp.where(valid, bce_el, 0.0)

            stats = [pr * mk, powp(pr)]
            if not skip_maskp:
                stats.append(powp(mk))         # mask^p
            stats.append(mk)                   # mask sum
            stats.append(bce_el)

            # (chunk_rows, 128) -> (8, 128): cross-vreg VPU adds, no XLU.
            return tuple(
                cr + s.reshape(groups, _SUBLANE, _LANE).sum(axis=0)
                for cr, s in zip(carry, stats))

        zero = tuple(jnp.zeros((_SUBLANE, _LANE), jnp.float32)
                     for _ in range(n_stats))
        part = lax.fori_loop(0, n_chunks, chunk_body, zero)
        for i in range(n_stats):               # one RMW per stat per grid step
            acc_ref[i] += part[i]

    if needs_mask:
        # Only the last grid step can contain invalid elements: trace a
        # masked variant for it and keep every other step mask-free.
        @pl.when(k != n_k - 1)
        def _():
            tile_update(False)

        @pl.when(k == n_k - 1)
        def _():
            tile_update(True)
    else:
        tile_update(False)

    @pl.when(k == n_k - 1)
    def _():
        def tot(i):
            return jnp.sum(acc_ref[i], keepdims=True)   # (1, 1)

        inter = tot(0)
        pred_pow = tot(1)
        if skip_maskp:
            mask_sum = tot(2)
            mask_pow = mask_sum                 # mk^p == mk on this path
            bce = tot(3)
        else:
            mask_pow = tot(2)
            mask_sum = tot(3)
            bce = tot(4)

        union = pred_pow + mask_pow
        dl = 1.0 - (2.0 * inter + dice_eps) / (union + dice_eps)
        dl = jnp.where(mask_sum > 0, dl, dice_alpha * dl)
        loss = alpha * bce + (1.0 - alpha) * dl             # (1, 1)
        out_ref[...] = jnp.broadcast_to(loss, out_ref.shape).astype(out_ref.dtype)


def combo_loss(pred, mask, *, alpha=0.5, beta=0.5, reduction='mean', p=1,
               dice_alpha=1.0, dice_eps=1.0, tile_rows=8192, chunk_rows=32,
               binary_mask=False, pred_bf16=False):
    """ComboLoss forward (alpha*BCE_w + (1-alpha)*DiceLoss), per PyTorch spec.

    pred/mask: same shape (B, ...).
    binary_mask=True: exact fast path for hard {0,1} masks (bf16 mask
        transfer, single-log BCE, mask^p statistic skipped).  Wrong for soft
        masks -- documented API hazard.
    pred_bf16=True: ship pred as bf16 (halves its HBM bytes; slightly degrades
        log(pred+eps) precision near 0/1 -- validate before enabling).
    """
    assert pred.shape == mask.shape, "Prediction and Mask must have same shape"
    assert reduction in ('mean', 'sum', 'none')
    assert 0.0 <= alpha <= 1.0 and 0.0 <= beta <= 1.0
    assert float(p) >= 1, "p must be >= 1"

    B = pred.shape[0]
    D = int(pred.size) // B
    pred2 = pred.reshape(B, D)
    mask2 = mask.reshape(B, D)
    if pred_bf16:
        pred2 = pred2.astype(jnp.bfloat16)
    if binary_mask:
        mask2 = mask2.astype(jnp.bfloat16)     # exact for {0,1}, -50% mask bytes

    # Lane-dense layout (B, rows, 128).  Zero-copy whenever D % 128 == 0 and
    # D >= 1024; otherwise pad minimally (pad values are masked in-kernel).
    rows = max(_SUBLANE, pl.cdiv(D, _LANE))
    d_pad = rows * _LANE
    if d_pad != D:
        pred2 = jnp.pad(pred2, ((0, 0), (0, d_pad - D)))
        mask2 = jnp.pad(mask2, ((0, 0), (0, d_pad - D)))
    pred3 = pred2.reshape(B, rows, _LANE)
    mask3 = mask2.reshape(B, rows, _LANE)

    # Chunk (vreg working set) and tile (VMEM block) sizing.  Both multiples
    # of 8, tile a multiple of chunk, tile <= rows; tiles are balanced so the
    # last (masked) tile does not waste a near-full block of compute.
    chunk_rows = max(_SUBLANE,
                     (min(int(chunk_rows), rows) // _SUBLANE) * _SUBLANE)
    tile_cap = max(chunk_rows,
                   (min(int(tile_rows), rows) // chunk_rows) * chunk_rows)
    n_bal = pl.cdiv(rows, tile_cap)
    tile_rows = min(tile_cap,
                    pl.cdiv(pl.cdiv(rows, n_bal), chunk_rows) * chunk_rows)
    n_tiles = pl.cdiv(rows, tile_rows)
    needs_mask = (n_tiles * tile_rows * _LANE) != D

    p_is_one = float(p) == 1.0
    n_stats = 4 if (p_is_one or binary_mask) else 5

    kernel = functools.partial(
        _combo_loss_kernel,
        alpha=float(alpha), beta=float(beta), p=p,
        dice_alpha=float(dice_alpha), dice_eps=float(dice_eps),
        binary_mask=bool(binary_mask),
        tile_rows=int(tile_rows), chunk_rows=int(chunk_rows),
        d_valid=int(D), needs_mask=bool(needs_mask))

    # Explicit scoped-VMEM budget: 2x double-buffered input blocks + slack.
    in_block_bytes = tile_rows * _LANE * (pred3.dtype.itemsize
                                          + mask3.dtype.itemsize)
    vmem_limit = int(max(2 * in_block_bytes + (8 << 20), 32 << 20))

    out = pl.pallas_call(
        kernel,
        out_shape=jax.ShapeDtypeStruct((B, _SUBLANE, _LANE), jnp.float32),
        grid_spec=pltpu.PrefetchScalarGridSpec(
            num_scalar_prefetch=0,
            grid=(B, n_tiles),
            in_specs=[
                pl.BlockSpec((1, tile_rows, _LANE), lambda b, k: (b, k, 0)),
                pl.BlockSpec((1, tile_rows, _LANE), lambda b, k: (b, k, 0)),
            ],
            out_specs=pl.BlockSpec((1, _SUBLANE, _LANE), lambda b, k: (b, 0, 0)),
            scratch_shapes=[pltpu.VMEM((n_stats, _SUBLANE, _LANE), jnp.float32)],
        ),
        compiler_params=pltpu.CompilerParams(
            dimension_semantics=("parallel", "arbitrary"),
            vmem_limit_bytes=vmem_limit),
    )(pred3, mask3)

    per_sample = out[:, 0, 0]
    if reduction == 'mean':
        return per_sample.mean()
    if reduction == 'sum':
        return per_sample.sum()
    return per_sample


def _combo_loss_ref(pred, mask, *, alpha=0.5, beta=0.5, reduction='mean', p=1,
                    dice_alpha=1.0, dice_eps=1.0):
    """Plain-JAX reference mirroring the PyTorch module."""
    B = pred.shape[0]
    pr = pred.reshape(B, -1).astype(jnp.float32)
    mk = mask.reshape(B, -1).astype(jnp.float32)
    inter = jnp.sum(pr * mk, axis=1)
    union = jnp.sum(pr ** p, axis=1) + jnp.sum(mk ** p, axis=1)
    dl = 1.0 - (2.0 * inter + dice_eps) / (union + dice_eps)
    dl = jnp.where(jnp.sum(mk, axis=1) > 0, dl, dice_alpha * dl)
    bce = -jnp.sum(beta * mk * jnp.log(pr + 1e-14)
                   + (1.0 - beta) * (1.0 - mk) * jnp.log(1.0 - pr + 1e-14),
                   axis=1)
    combo = alpha * bce + (1.0 - alpha) * dl
    if reduction == 'mean':
        return combo.mean()
    if reduction == 'sum':
        return combo.sum()
    return combo


if __name__ == "__main__":
    key = jax.random.PRNGKey(0)
    k1, k2, k3, k4, k5, k6 = jax.random.split(key, 6)

    # Test 1: aligned D (zero-copy, no masking), p=1, reduction='mean',
    # one all-zero-mask sample to exercise the dice `where` branch.
    B, C, H, W = 2, 4, 16, 16
    pred = jax.nn.sigmoid(jax.random.normal(k1, (B, C, H, W), dtype=jnp.float32))
    mask = (jax.random.uniform(k2, (B, C, H, W)) > 0.7).astype(jnp.float32)
    mask = mask.at[1].set(0.0)

    out1 = jax.block_until_ready(
        combo_loss(pred, mask, alpha=0.5, beta=0.5, reduction='mean', p=1))
    ref1 = _combo_loss_ref(pred, mask, alpha=0.5, beta=0.5,
                           reduction='mean', p=1)
    assert jnp.allclose(out1, ref1, rtol=1e-5, atol=1e-5), (out1, ref1)

    # Test 2: unaligned D (minimal lane pad + in-kernel tail masking, block
    # overhang on the last tile), p=2, binary-mask fast path (mask^p skipped),
    # multi-tile grid, reduction='none'.
    B2, C2, H2, W2 = 2, 3, 20, 20
    pred_b = jax.nn.sigmoid(jax.random.normal(k3, (B2, C2, H2, W2),
                                              dtype=jnp.float32))
    mask_b = (jax.random.uniform(k4, (B2, C2, H2, W2)) > 0.5).astype(jnp.float32)

    out2 = jax.block_until_ready(
        combo_loss(pred_b, mask_b, alpha=0.5, beta=0.3, reduction='none', p=2,
                   binary_mask=True, tile_rows=8, chunk_rows=8))
    ref2 = _combo_loss_ref(pred_b, mask_b, alpha=0.5, beta=0.3,
                           reduction='none', p=2)
    assert jnp.allclose(out2, ref2, rtol=1e-5, atol=1e-5), (out2, ref2)

    # Test 3: soft masks (exact two-log BCE, 5-stat path), p=3, several grid
    # steps and several chunks per step, reduction='sum'.
    B3, C3, H3, W3 = 2, 4, 64, 64          # D = 16384 -> rows = 128
    pred_c = jax.nn.sigmoid(jax.random.normal(k5, (B3, C3, H3, W3),
                                              dtype=jnp.float32))
    mask_c = jax.random.uniform(k6, (B3, C3, H3, W3), dtype=jnp.float32)

    out3 = jax.block_until_ready(
        combo_loss(pred_c, mask_c, alpha=0.7, beta=0.4, reduction='sum', p=3,
                   tile_rows=32, chunk_rows=16))
    ref3 = _combo_loss_ref(pred_c, mask_c, alpha=0.7, beta=0.4,
                           reduction='sum', p=3)
    assert jnp.allclose(out3, ref3, rtol=1e-5, atol=1e-5), (out3, ref3)

    print("KERNEL_OK")
</pallas_src>

<mosaic_0001>
module attributes {stable_mosaic.version = 11 : i64} {
  func.func @_combo_loss_kernel(%arg0: i32, %arg1: i32, %arg2: memref<1x8x128xf32, #tpu.memory_space<vmem>>, %arg3: memref<1x8x128xf32, #tpu.memory_space<vmem>>, %arg4: memref<1x8x128xf32, #tpu.memory_space<vmem>>, %arg5: memref<4x8x128xf32, #tpu.memory_space<vmem>>) attributes {dimension_semantics = [#tpu.dimension_semantics<parallel>, #tpu.dimension_semantics<arbitrary>], iteration_bounds = array<i64: 2, 1>, scalar_prefetch = 0 : i64, scratch_operands = 1 : i64, tpu.core_type = #tpu.core_type<tc>, window_params = [{transform_indices = @transform_0, window_bounds = array<i64: 1, 8, 128>}, {transform_indices = @transform_1, window_bounds = array<i64: 1, 8, 128>}, {transform_indices = @transform_2, window_bounds = array<i64: 1, 8, 128>}]} {
    %c0_i32 = arith.constant 0 : i32
    %0 = arith.cmpi eq, %arg1, %c0_i32 : i32
    %1 = arith.extui %0 : i1 to i32
    %c0_i32_0 = arith.constant 0 : i32
    %2 = arith.cmpi ne, %1, %c0_i32_0 : i32
    scf.if %2 {
      %cst_42 = arith.constant 0.000000e+00 : f32
      %74 = vector.broadcast %cst_42 : f32 to vector<4x8x128xf32>
      %c0_43 = arith.constant 0 : index
      %c0_44 = arith.constant 0 : index
      %c0_45 = arith.constant 0 : index
      %75 = vector.load %arg5[%c0_43, %c0_44, %c0_45] : memref<4x8x128xf32, #tpu.memory_space<vmem>>, vector<4x8x128xf32>
      tpu.vector_store %arg5[%c0_43, %c0_44, %c0_45], %74 {strides = array<i32>} : memref<4x8x128xf32, #tpu.memory_space<vmem>>, vector<4x8x128xf32>,
    } else {
    }
    %cst = arith.constant 0.000000e+00 : f32
    %3 = vector.broadcast %cst : f32 to vector<8x128xf32>
    %cst_1 = arith.constant 0.000000e+00 : f32
    %4 = vector.broadcast %cst_1 : f32 to vector<8x128xf32>
    %cst_2 = arith.constant 0.000000e+00 : f32
    %5 = vector.broadcast %cst_2 : f32 to vector<8x128xf32>
    %cst_3 = arith.constant 0.000000e+00 : f32
    %6 = vector.broadcast %cst_3 : f32 to vector<8x128xf32>
    %c0_i32_4 = arith.constant 0 : i32
    %c8_i32 = arith.constant 8 : i32
    %7 = arith.muli %c0_i32_4, %c8_i32 : i32
    %8 = tpu.assume_multiple %7, 8 : i32
    %c0 = arith.constant 0 : index
    %9 = arith.index_cast %8 : i32 to index
    %c0_5 = arith.constant 0 : index
    %10 = vector.load %arg2[%c0, %9, %c0_5] : memref<1x8x128xf32, #tpu.memory_space<vmem>>, vector<1x8x128xf32>
    %11 = vector.shape_cast %10 : vector<1x8x128xf32> to vector<8x128xf32>
    %c0_6 = arith.constant 0 : index
    %12 = arith.index_cast %8 : i32 to index
    %c0_7 = arith.constant 0 : index
    %13 = vector.load %arg3[%c0_6, %12, %c0_7] : memref<1x8x128xf32, #tpu.memory_space<vmem>>, vector<1x8x128xf32>
    %14 = vector.shape_cast %13 : vector<1x8x128xf32> to vector<8x128xf32>
    %cst_8 = arith.constant 9.99999982E-15 : f32
    %15 = vector.broadcast %cst_8 : f32 to vector<8x128xf32>
    %16 = arith.addf %11, %15 : vector<8x128xf32>
    %17 = math.log %16 : vector<8x128xf32>
    %cst_9 = arith.constant 1.000000e+00 : f32
    %18 = vector.broadcast %cst_9 : f32 to vector<8x128xf32>
    %19 = arith.subf %18, %11 : vector<8x128xf32>
    %cst_10 = arith.constant 9.99999982E-15 : f32
    %20 = vector.broadcast %cst_10 : f32 to vector<8x128xf32>
    %21 = arith.addf %19, %20 : vector<8x128xf32>
    %22 = math.log %21 : vector<8x128xf32>
    %cst_11 = arith.constant 5.000000e-01 : f32
    %23 = vector.broadcast %cst_11 : f32 to vector<8x128xf32>
    %24 = arith.mulf %23, %17 : vector<8x128xf32>
    %cst_12 = arith.constant 5.000000e-01 : f32
    %25 = vector.broadcast %cst_12 : f32 to vector<8x128xf32>
    %26 = arith.mulf %25, %22 : vector<8x128xf32>
    %27 = arith.subf %24, %26 : vector<8x128xf32>
    %28 = arith.mulf %14, %27 : vector<8x128xf32>
    %cst_13 = arith.constant 5.000000e-01 : f32
    %29 = vector.broadcast %cst_13 : f32 to vector<8x128xf32>
    %30 = arith.mulf %29, %22 : vector<8x128xf32>
    %31 = arith.addf %28, %30 : vector<8x128xf32>
    %cst_14 = arith.constant 0.000000e+00 : f32
    %32 = vector.broadcast %cst_14 : f32 to vector<8x128xf32>
    %33 = arith.subf %32, %31 : vector<8x128xf32>
    %34 = arith.mulf %11, %14 : vector<8x128xf32>
    %35 = vector.shape_cast %34 : vector<8x128xf32> to vector<1x8x128xf32>
    %cst_15 = arith.constant dense<0.000000e+00> : vector<8x128xf32>
    %36 = vector.multi_reduction <add>, %35, %cst_15 [0] : vector<1x8x128xf32> to vector<8x128xf32>
    %37 = arith.addf %3, %36 : vector<8x128xf32>
    %38 = vector.shape_cast %11 : vector<8x128xf32> to vector<1x8x128xf32>
    %cst_16 = arith.constant dense<0.000000e+00> : vector<8x128xf32>
    %39 = vector.multi_reduction <add>, %38, %cst_16 [0] : vector<1x8x128xf32> to vector<8x128xf32>
    %40 = arith.addf %4, %39 : vector<8x128xf32>
    %41 = vector.shape_cast %14 : vector<8x128xf32> to vector<1x8x128xf32>
    %cst_17 = arith.constant dense<0.000000e+00> : vector<8x128xf32>
    %42 = vector.multi_reduction <add>, %41, %cst_17 [0] : vector<1x8x128xf32> to vector<8x128xf32>
    %43 = arith.addf %5, %42 : vector<8x128xf32>
    %44 = vector.shape_cast %33 : vector<8x128xf32> to vector<1x8x128xf32>
    %cst_18 = arith.constant dense<0.000000e+00> : vector<8x128xf32>
    %45 = vector.multi_reduction <add>, %44, %cst_18 [0] : vector<1x8x128xf32> to vector<8x128xf32>
    %46 = arith.addf %6, %45 : vector<8x128xf32>
    %c1_i32 = arith.constant 1 : i32
    %c0_19 = arith.constant 0 : index
    %c0_20 = arith.constant 0 : index
    %c0_21 = arith.constant 0 : index
    %47 = vector.load %arg5[%c0_19, %c0_20, %c0_21] : memref<4x8x128xf32, #tpu.memory_space<vmem>>, vector<1x8x128xf32>
    %48 = vector.shape_cast %47 : vector<1x8x128xf32> to vector<8x128xf32>
    %49 = arith.addf %48, %37 : vector<8x128xf32>
    %c0_22 = arith.constant 0 : index
    %c0_23 = arith.constant 0 : index
    %c0_24 = arith.constant 0 : index
    %50 = vector.load %arg5[%c0_22, %c0_23, %c0_24] : memref<4x8x128xf32, #tpu.memory_space<vmem>>, vector<1x8x128xf32>
    %51 = vector.shape_cast %50 : vector<1x8x128xf32> to vector<8x128xf32>
    %52 = vector.shape_cast %49 : vector<8x128xf32> to vector<1x8x128xf32>
    tpu.vector_store %arg5[%c0_22, %c0_23, %c0_24], %52 {strides = array<i32>} : memref<4x8x128xf32, #tpu.memory_space<vmem>>, vector<1x8x128xf32>,
    %c1 = arith.constant 1 : index
    %c0_25 = arith.constant 0 : index
    %c0_26 = arith.constant 0 : index
    %53 = vector.load %arg5[%c1, %c0_25, %c0_26] : memref<4x8x128xf32, #tpu.memory_space<vmem>>, vector<1x8x128xf32>
    %54 = vector.shape_cast %53 : vector<1x8x128xf32> to vector<8x128xf32>
    %55 = arith.addf %54, %40 : vector<8x128xf32>
    %c1_27 = arith.constant 1 : index
    %c0_28 = arith.constant 0 : index
    %c0_29 = arith.constant 0 : index
    %56 = vector.load %arg5[%c1_27, %c0_28, %c0_29] : memref<4x8x128xf32, #tpu.memory_space<vmem>>, vector<1x8x128xf32>
    %57 = vector.shape_cast %56 : vector<1x8x128xf32> to vector<8x128xf32>
    %58 = vector.shape_cast %55 : vector<8x128xf32> to vector<1x8x128xf32>
    tpu.vector_store %arg5[%c1_27, %c0_28, %c0_29], %58 {strides = array<i32>} : memref<4x8x128xf32, #tpu.memory_space<vmem>>, vector<1x8x128xf32>,
    %c2 = arith.constant 2 : index
    %c0_30 = arith.constant 0 : index
    %c0_31 = arith.constant 0 : index
    %59 = vector.load %arg5[%c2, %c0_30, %c0_31] : memref<4x8x128xf32, #tpu.memory_space<vmem>>, vector<1x8x128xf32>
    %60 = vector.shape_cast %59 : vector<1x8x128xf32> to vector<8x128xf32>
    %61 = arith.addf %60, %43 : vector<8x128xf32>
    %c2_32 = arith.constant 2 : index
    %c0_33 = arith.constant 0 : index
    %c0_34 = arith.constant 0 : index
    %62 = vector.load %arg5[%c2_32, %c0_33, %c0_34] : memref<4x8x128xf32, #tpu.memory_space<vmem>>, vector<1x8x128xf32>
    %63 = vector.shape_cast %62 : vector<1x8x128xf32> to vector<8x128xf32>
    %64 = vector.shape_cast %61 : vector<8x128xf32> to vector<1x8x128xf32>
    tpu.vector_store %arg5[%c2_32, %c0_33, %c0_34], %64 {strides = array<i32>} : memref<4x8x128xf32, #tpu.memory_space<vmem>>, vector<1x8x128xf32>,
    %c3 = arith.constant 3 : index
    %c0_35 = arith.constant 0 : index
    %c0_36 = arith.constant 0 : index
    %65 = vector.load %arg5[%c3, %c0_35, %c0_36] : memref<4x8x128xf32, #tpu.memory_space<vmem>>, vector<1x8x128xf32>
    %66 = vector.shape_cast %65 : vector<1x8x128xf32> to vector<8x128xf32>
    %67 = arith.addf %66, %46 : vector<8x128xf32>
    %c3_37 = arith.constant 3 : index
    %c0_38 = arith.constant 0 : index
    %c0_39 = arith.constant 0 : index
    %68 = vector.load %arg5[%c3_37, %c0_38, %c0_39] : memref<4x8x128xf32, #tpu.memory_space<vmem>>, vector<1x8x128xf32>
    %69 = vector.shape_cast %68 : vector<1x8x128xf32> to vector<8x128xf32>
    %70 = vector.shape_cast %67 : vector<8x128xf32> to vector<1x8x128xf32>
    tpu.vector_store %arg5[%c3_37, %c0_38, %c0_39], %70 {strides = array<i32>} : memref<4x8x128xf32, #tpu.memory_space<vmem>>, vector<1x8x128xf32>,
    %c0_i32_40 = arith.constant 0 : i32
    %71 = arith.cmpi eq, %arg1, %c0_i32_40 : i32
    %72 = arith.extui %71 : i1 to i32
    %c0_i32_41 = arith.constant 0 : i32
    %73 = arith.cmpi ne, %72, %c0_i32_41 : i32
    scf.if %73 {
      %c0_42 = arith.constant 0 : index
      %c0_43 = arith.constant 0 : index
      %c0_44 = arith.constant 0 : index
      %74 = vector.load %arg5[%c0_42, %c0_43, %c0_44] : memref<4x8x128xf32, #tpu.memory_space<vmem>>, vector<1x8x128xf32>
      %75 = vector.shape_cast %74 : vector<1x8x128xf32> to vector<8x128xf32>
      %76 = vector.shape_cast %75 : vector<8x128xf32> to vector<1x8x128xf32>
      %cst_45 = arith.constant dense<0.000000e+00> : vector<1xf32>
      %77 = vector.multi_reduction <add>, %76, %cst_45 [1, 2] : vector<1x8x128xf32> to vector<1xf32>
      %78 = vector.shape_cast %77 : vector<1xf32> to vector<1x1x1xf32>
      %79 = vector.extract %78[0, 0, 0] : f32 from vector<1x1x1xf32>
      %80 = vector.broadcast %79 : f32 to vector<1x1xf32>
      %c1_46 = arith.constant 1 : index
      %c0_47 = arith.constant 0 : index
      %c0_48 = arith.constant 0 : index
      %81 = vector.load %arg5[%c1_46, %c0_47, %c0_48] : memref<4x8x128xf32, #tpu.memory_space<vmem>>, vector<1x8x128xf32>
      %82 = vector.shape_cast %81 : vector<1x8x128xf32> to vector<8x128xf32>
      %83 = vector.shape_cast %82 : vector<8x128xf32> to vector<1x8x128xf32>
      %cst_49 = arith.constant dense<0.000000e+00> : vector<1xf32>
      %84 = vector.multi_reduction <add>, %83, %cst_49 [1, 2] : vector<1x8x128xf32> to vector<1xf32>
      %85 = vector.shape_cast %84 : vector<1xf32> to vector<1x1x1xf32>
      %86 = vector.extract %85[0, 0, 0] : f32 from vector<1x1x1xf32>
      %87 = vector.broadcast %86 : f32 to vector<1x1xf32>
      %c2_50 = arith.constant 2 : index
      %c0_51 = arith.constant 0 : index
      %c0_52 = arith.constant 0 : index
      %88 = vector.load %arg5[%c2_50, %c0_51, %c0_52] : memref<4x8x128xf32, #tpu.memory_space<vmem>>, vector<1x8x128xf32>
      %89 = vector.shape_cast %88 : vector<1x8x128xf32> to vector<8x128xf32>
      %90 = vector.shape_cast %89 : vector<8x128xf32> to vector<1x8x128xf32>
      %cst_53 = arith.constant dense<0.000000e+00> : vector<1xf32>
      %91 = vector.multi_reduction <add>, %90, %cst_53 [1, 2] : vector<1x8x128xf32> to vector<1xf32>
      %92 = vector.shape_cast %91 : vector<1xf32> to vector<1x1x1xf32>
      %93 = vector.extract %92[0, 0, 0] : f32 from vector<1x1x1xf32>
      %94 = vector.broadcast %93 : f32 to vector<1x1xf32>
      %c3_54 = arith.constant 3 : index
      %c0_55 = arith.constant 0 : index
      %c0_56 = arith.constant 0 : index
      %95 = vector.load %arg5[%c3_54, %c0_55, %c0_56] : memref<4x8x128xf32, #tpu.memory_space<vmem>>, vector<1x8x128xf32>
      %96 = vector.shape_cast %95 : vector<1x8x128xf32> to vector<8x128xf32>
      %97 = vector.shape_cast %96 : vector<8x128xf32> to vector<1x8x128xf32>
      %cst_57 = arith.constant dense<0.000000e+00> : vector<1xf32>
      %98 = vector.multi_reduction <add>, %97, %cst_57 [1, 2] : vector<1x8x128xf32> to vector<1xf32>
      %99 = vector.shape_cast %98 : vector<1xf32> to vector<1x1x1xf32>
      %100 = vector.extract %99[0, 0, 0] : f32 from vector<1x1x1xf32>
      %101 = vector.broadcast %100 : f32 to vector<1x1xf32>
      %102 = arith.addf %87, %94 : vector<1x1xf32>
      %cst_58 = arith.constant 2.000000e+00 : f32
      %103 = vector.broadcast %cst_58 : f32 to vector<1x1xf32>
      %104 = arith.mulf %103, %80 : vector<1x1xf32>
      %cst_59 = arith.constant 1.000000e+00 : f32
      %105 = vector.broadcast %cst_59 : f32 to vector<1x1xf32>
      %106 = arith.addf %104, %105 : vector<1x1xf32>
      %cst_60 = arith.constant 1.000000e+00 : f32
      %107 = vector.broadcast %cst_60 : f32 to vector<1x1xf32>
      %108 = arith.addf %102, %107 : vector<1x1xf32>
      %109 = arith.divf %106, %108 : vector<1x1xf32>
      %cst_61 = arith.constant 1.000000e+00 : f32
      %110 = vector.broadcast %cst_61 : f32 to vector<1x1xf32>
      %111 = arith.subf %110, %109 : vector<1x1xf32>
      %cst_62 = arith.constant 0.000000e+00 : f32
      %112 = vector.broadcast %cst_62 : f32 to vector<1x1xf32>
      %113 = arith.cmpf ogt, %94, %112 : vector<1x1xf32>
      %cst_63 = arith.constant 1.000000e+00 : f32
      %114 = vector.broadcast %cst_63 : f32 to vector<1x1xf32>
      %115 = arith.mulf %114, %111 : vector<1x1xf32>
      %116 = arith.select %113, %111, %115 : vector<1x1xi1>, vector<1x1xf32>
      %cst_64 = arith.constant 5.000000e-01 : f32
      %117 = vector.broadcast %cst_64 : f32 to vector<1x1xf32>
      %118 = arith.mulf %117, %101 : vector<1x1xf32>
      %cst_65 = arith.constant 5.000000e-01 : f32
      %119 = vector.broadcast %cst_65 : f32 to vector<1x1xf32>
      %120 = arith.mulf %119, %116 : vector<1x1xf32>
      %121 = arith.addf %118, %120 : vector<1x1xf32>
      %122 = vector.shape_cast %121 : vector<1x1xf32> to vector<1x1x1xf32>
      %123 = vector.broadcast %122 : vector<1x1x1xf32> to vector<1x8x128xf32>
      %c0_66 = arith.constant 0 : index
      %c0_67 = arith.constant 0 : index
      %c0_68 = arith.constant 0 : index
      %124 = vector.load %arg4[%c0_66, %c0_67, %c0_68] : memref<1x8x128xf32, #tpu.memory_space<vmem>>, vector<1x8x128xf32>
      tpu.vector_store %arg4[%c0_66, %c0_67, %c0_68], %123 {strides = array<i32>} : memref<1x8x128xf32, #tpu.memory_space<vmem>>, vector<1x8x128xf32>,
    } else {
    }
    return
  }
  func.func @transform_0(%arg0: i32, %arg1: i32) -> (i32, i32, i32) {
    %c0_i32 = arith.constant 0 : i32
    %c0_i32_0 = arith.constant 0 : i32
    return %arg0, %arg1, %c0_i32 : i32, i32, i32
  }
  func.func @transform_1(%arg0: i32, %arg1: i32) -> (i32, i32, i32) {
    %c0_i32 = arith.constant 0 : i32
    %c0_i32_0 = arith.constant 0 : i32
    return %arg0, %arg1, %c0_i32 : i32, i32, i32
  }
  func.func @transform_2(%arg0: i32, %arg1: i32) -> (i32, i32, i32) {
    %c0_i32 = arith.constant 0 : i32
    %c0_i32_0 = arith.constant 0 : i32
    %c0_i32_1 = arith.constant 0 : i32
    return %arg0, %c0_i32, %c0_i32_0 : i32, i32, i32
  }
}

</mosaic_0001>

<bundles_post_ra>
// kernel: tpu_custom_call.1
= control target key start
LH: loop header
LB: loop body
LE: loop exit
PB: predicated region body
PF: predicated region fallthrough
CT: control target
= control target key end

     0   :  { %7 = vsyncpa [#allocation4], 0  ;;  %s924_s0 = inlined_call_operand.hbm [shape: f32[2,8,128], index: 0, kind: input, shape index: {}]   ;;  %s925_s1 = inlined_call_operand.hbm [shape: f32[2,8,128], index: 1, kind: input, shape index: {}]   ;;  %s926_s2 = inlined_call_operand.hbm [shape: f32[2,8,128], index: 2, kind: output, shape index: {}]  }
   0x1   :  { %9 = vsyncpa [#allocation4 + $0x1], 0 }
   0x2   :  { %10 = vsyncpa [#allocation7], 0 }
   0x3   :  { %12 = vsyncpa [#allocation7 + $0x1], 0 }
   0x4   :  { %13 = vsyncpa [#allocation5], 0 }
   0x5   :  { %15 = vsyncpa [#allocation5 + $0x1], 0  ;;  %s699_s9 = smov 0   ;;  %s701_s10 = smov 0  }
   0x6   :  { %s703_s11 = smov 0   ;;  %s705_s12 = smov 0  }
   0x7   :  { %s707_s13 = smov 0   ;;  %s709_s14 = smov 0  }
   0x8 LB: > { %s436_s15 = sadd.s32 4294967295, %s679_s14   ;;  %s437_s16 = sadd.s32 4294967294, %s679_s14   ;;  %s679_s14 = sphi %s709_s14, %s21_s14   ;;  %s675_s13 = sphi %s707_s13, %s946_s13   ;;  %s671_s12 = sphi %s705_s12, %s945_s12   ;;  %s667_s11 = sphi %s703_s11, %s944_s11   ;;  %s663_s10 = sphi %s701_s10, %s943_s10   ;;  %s659_s9 = sphi %s699_s9, %s942_s9  }
   0x9   : > { %s33_s17 = sadd.s32 1, %s675_s13  ;;  %s42_s18 = sadd.s32 1, %s667_s11 }
   0xa   : > { %p35_p0 = scmp.ge.s32.totalorder %s33_s17, 2  ;;  %p49_p1 = scmp.ne.s32.totalorder %s667_s11, %s663_s10 }
   0xb   : > { %p50_p2 = scmp.eq.s32.totalorder %s679_s14, 0  ;;  %p55_p3 = scmp.ne.s32.totalorder %s663_s10, %s659_s9 }
   0xc   : > { %s948_s17 = smov (%p35_p0, %s33_s17), 0  ;;  %p56_p5 = scmp.eq.s32.totalorder %s436_s15, 0 }
   0xd   : > { %p740_p4 = por %p50_p2, %p49_p1  ;;  %s37_s20 = ssub.s32 %s675_s13, %s948_s17 }
   0xe   : > { %p107_p6 = scmp.eq.s32.totalorder %s436_s15, 1  ;;  %p40_p7 = scmp.eq.s32.totalorder %s37_s20, 0 }
   0xf   : > { %p746_p8 = por %p56_p5, %p55_p3  ;;  %p113_p10 = scmp.eq.s32.totalorder %s437_s16, 1 }
  0x10   : > { %p750_p9 = por %p107_p6, %p49_p1  ;;  %p477_p13 = scmp.lt.s32.totalorder %s679_s14, 2 }
  0x11   : > { %s930_s21 = scalar_select %p746_p8, 1, 0 }
  0x12   : > { %s931_s22 = scalar_select %p750_p9, 1, 0 }
  0x13   : > { %s755_s23 = scalar_select %p40_p7, %s667_s11, %s42_s18  }
  0x14   : > { %p757_p11 = por %p113_p10, %p55_p3  ;;  %s764_s25 = sand.u32 1, %s667_s11  }
  0x15   : > { %s440_s26 = sshll.u32 %s764_s25, 3  ;;  %s441_s27 = sshll.u32 %s675_s13, 7 }
  0x16   : > { %s932_s24 = scalar_select %p757_p11, 1, 0 }
  0x17   : > { %s773_s30 = scalar_lea.hbm %s924_s0, %s441_s27  ;;  %s137_s3 = scalar_lea.vmem [#allocation3], %s440_s26 }
  0x18   : > { %s145_s4 = sshll.u32 %s137_s3, 4  ;;  %p781_p0 = pnand %p477_p13, %p740_p4  ;;  %s777_s4 = int_to_ptr.vmem [resolvable:$true] %s145_s4 }
  0x19   : > { %s134_s6 = scalar_lea.sflag [#allocation4], %s764_s25  ;;  %s533_s7 = scalar_lea.hbm %s773_s30, 128 }
  0x1a   : > { %p534_p3 = scmp.ne.s32.totalorder %s773_s30, %s533_s7  ;;  %p535_p5 = pneg %p781_p0 }
  0x1b   : > { %s538_s16 = scalar_lea.hbm %s924_s0, 256  ;;  %p539_p4 = scmp.lt.u32.totalorder %s773_s30, %s924_s0 }
  0x1c   : > { %p536_p6 = pnand %p535_p5, %p534_p3  ;;  %p540_p10 = scmp.lt.u32.totalorder %s538_s16, %s533_s7 }
  0x1d   : > { %p542_p12 = scmp.lt.u32.totalorder %s533_s7, %s773_s30 }
  0x1e   : > { %p537_p7 = pneg %p536_p6  ;;  %p541_p13 = por %p540_p10, %p539_p4 }
  0x20   : > { %p543_p1 = por %p542_p12, %p541_p13 }
  0x22   : > { %p544_p2 = pnand %p543_p1, %p537_p7 }
  0x24   : > { %547 = shalt.err (!%p544_p2)
}
  0x25   : > { %s548_s20 = scalar_lea.vmem %s777_s4, 128  ;;  %s681_s28 = smov [#allocation3]  }
  0x26   : > { %p549_p3 = scmp.ne.s32.totalorder %s777_s4, %s548_s20  ;;  %s553_s29 = sshll.u32 %s681_s28, 4  ;;  %s554_s29 = int_to_ptr.vmem [resolvable:$false] %s553_s29 }
  0x27   : > { %s555_s3 = scalar_lea.vmem %s554_s29, 256  ;;  %p556_p9 = scmp.lt.s32.totalorder %s777_s4, %s554_s29 }
  0x28   : > { %p551_p6 = pnand %p549_p3, %p535_p5  ;;  %p557_p4 = scmp.lt.s32.totalorder %s555_s3, %s548_s20 }
  0x2a   : > { %p552_p11 = pneg %p551_p6  ;;  %p558_p10 = por %p557_p4, %p556_p9 }
  0x2c   : > { %p559_p12 = pnand %p558_p10, %p552_p11 }
  0x2e   : > { %562 = shalt.err (!%p559_p12)
}
  0x2f   : > { %469 = dma.hbm_to_vmem [thread:$0]  (!%p781_p0), %s773_s30, 128, %s777_s4, %s134_s6  }
  0x30   : > { %p934_p1 = scmp.lt.s32.totalorder %s679_s14, 3  ;;  %p935_p2 = scmp.ge.s32.totalorder %s679_s14, 1 }
  0x31   : > { %s826_s16 = scalar_lea.hbm %s925_s1, %s441_s27  ;;  %s156_s18 = scalar_lea.vmem [#allocation6], %s440_s26 }
  0x32   : > { %p817_p7 = pnand %p935_p2, %p934_p1  ;;  %s164_s19 = sshll.u32 %s156_s18, 4  ;;  %s165_s19 = int_to_ptr.vmem [resolvable:$true] %s164_s19 }
  0x33   : > { %s153_s30 = scalar_lea.sflag [#allocation7], %s764_s25  ;;  %s563_s4 = scalar_lea.hbm %s826_s16, 128 }
  0x34   : > { %s936_s7 = scalar_select %p817_p7, 1, 0 }
  0x35   : > { %p564_p9 = scmp.ne.s32.totalorder %s826_s16, %s563_s4  ;;  %s568_s27 = scalar_lea.hbm %s925_s1, 256 }
  0x36   : > { %p569_p3 = scmp.lt.u32.totalorder %s826_s16, %s925_s1  ;;  %p570_p6 = scmp.lt.u32.totalorder %s568_s27, %s563_s4 }
  0x37   : > { %p566_p11 = pnand %p564_p9, %p535_p5  ;;  %p572_p10 = scmp.lt.u32.totalorder %s563_s4, %s826_s16 }
  0x38   : > { %p571_p4 = por %p570_p6, %p569_p3 }
  0x39   : > { %p567_p13 = pneg %p566_p11 }
  0x3a   : > { %p573_p12 = por %p572_p10, %p571_p4 }
  0x3c   : > { %p574_p1 = pnand %p573_p12, %p567_p13 }
  0x3e   : > { %577 = shalt.err (!%p574_p1)
}
  0x3f   : > { %s578_s25 = scalar_lea.vmem %s165_s19, 128  ;;  %s682_s26 = smov [#allocation6]  }
  0x40   : > { %p579_p2 = scmp.ne.s32.totalorder %s165_s19, %s578_s25  ;;  %s583_s3 = sshll.u32 %s682_s26, 4  ;;  %s584_s3 = int_to_ptr.vmem [resolvable:$false] %s583_s3 }
  0x41   : > { %s585_s8 = scalar_lea.vmem %s584_s3, 256  ;;  %p586_p8 = scmp.lt.s32.totalorder %s165_s19, %s584_s3 }
  0x42   : > { %p581_p9 = pnand %p579_p2, %p535_p5  ;;  %p587_p7 = scmp.lt.s32.totalorder %s585_s8, %s578_s25 }
  0x44   : > { %p582_p11 = pneg %p581_p9  ;;  %p588_p3 = por %p587_p7, %p586_p8 }
  0x46   : > { %p589_p6 = pnand %p588_p3, %p582_p11 }
  0x48   : > { %592 = shalt.err (!%p589_p6)
}
  0x49   : > { %472 = dma.hbm_to_vmem [thread:$0]  (!%p781_p0), %s826_s16, 128, %s165_s19, %s153_s30  }
  0x4a   : > { %p937_p13 = scmp.ne.s32.totalorder %s936_s7, 0 }
  0x4b   : > { %s853_s15 = sand.u32 (!%p937_p13), 1, %s663_s10   ;;  %p938_p8 = scmp.ne.s32.totalorder (!%p937_p13), %s930_s21, 0 }
  0x4c   : > { %173 = sbr.rel (%p937_p13) target bundleno = 337 (0x151), region = 28  ;;  %s856_s18 = sshll.u32 (!%p937_p13), %s853_s15, 3 }
  0x4d   : > { %s176_s4 = scalar_lea.sflag (!%p937_p13), [#allocation4], %s853_s15  ;;  %s179_s6 = scalar_lea.vmem (!%p937_p13), [#allocation3], %s856_s18 }
  0x53   : > { %646 = dma.done.wait (%p938_p8), %s176_s4, 128  }
  0x54   : > { %648 = vsyncadd (%p938_p8), %s176_s4, 4294967168  ;;  %s185_s5 = scalar_lea.sflag [#allocation7], %s853_s15  ;;  %s188_s7 = scalar_lea.vmem [#allocation6], %s856_s18 }
  0x55   : > { %650 = dma.done.wait (%p938_p8), %s185_s5, 128  }
  0x56   : > { %652 = vsyncadd (%p938_p8), %s185_s5, 4294967168  ;;  %v223_v0 = vld [vmem:[%s188_s7] sm:$0xff]  ;;  %v222_v1 = vld [vmem:[%s179_s6] sm:$0xff]  ;;  %s449_s20 = sshll.u32 %s671_s12, 7  ;;  %s213_s27 = scalar_lea.vmem [#allocation8], %s856_s18 }
  0x57   : > { %287 = vadd.xlane.f32.xlu1 %v223_v0  ;;  %v237_v2 = vmul.f32 %v223_v0, %v222_v1  ;;  %v224_v3 = vadd.f32 1e-14, %v222_v1  ;;  %v227_v4 = vsub.f32 1.0, %v222_v1  ;;  %s333_s28 = sshll.u32 %s213_s27, 4  ;;  %s875_s26 = scalar_lea.hbm %s926_s2, %s449_s20  ;;  %s877_s28 = int_to_ptr.vmem [resolvable:$true] %s333_s28 }
  0x58   : > { %s320_s3 = scalar_lea.sflag [#allocation5], %s853_s15  ;;  %s593_s8 = scalar_lea.vmem %s877_s28, 128 }
  0x59   : > { %265 = vadd.xlane.f32.xlu0 %v237_v2  ;;  %527 = vlog2.f32 %v224_v3  ;;  %v228_v5 = vadd.f32 1e-14, %v227_v4  ;;  %p594_p0 = scmp.ne.s32.totalorder %s877_s28, %s593_s8  ;;  %p939_p5 = scmp.ne.s32.totalorder %s931_s22, 0 }
  0x5a   : > { %s683_s12 = smov [#allocation8]  }
  0x5b   : > { %529 = vlog2.f32 %v228_v5  ;;  %p595_p7 = pnand %p594_p0, %p939_p5  ;;  %s597_s18 = sshll.u32 %s683_s12, 4  ;;  %s598_s18 = int_to_ptr.vmem [resolvable:$false] %s597_s18 }
  0x5c   : > { %s599_s4 = scalar_lea.vmem %s598_s18, 256  ;;  %p600_p10 = scmp.lt.s32.totalorder %s877_s28, %s598_s18 }
  0x5d   : > { %276 = vadd.xlane.f32.xlu0 %v222_v1  ;;  %p596_p4 = pneg %p595_p7  ;;  %p601_p12 = scmp.lt.s32.totalorder %s599_s4, %s593_s8 }
  0x5f   : > { %p602_p1 = por %p601_p12, %p600_p10 }
  0x61   : > { %p603_p2 = pnand %p602_p1, %p596_p4 }
  0x63   : > { %v528_v6 = vpop.eup %527 }
  0x64   : > { %v226_v7 = vmul.f32 0.6931472, %v528_v6 }
  0x65   : > { %v530_v8 = vpop.eup %529 }
  0x66   : > { %v230_v9 = vmul.f32 0.6931472, %v530_v8  ;;  %v231_v10 = vmul.f32 0.5, %v226_v7 }
  0x68   : > { %v232_v11 = vmul.f32 0.5, %v230_v9 }
  0x6a   : > { %v233_v12 = vsub.f32 %v231_v10, %v232_v11 }
  0x6c   : > { %v234_v13 = vmul.f32 %v233_v12, %v223_v0 }
  0x6e   : > { %v235_v14 = vadd.f32 %v234_v13, %v232_v11 }
  0x70   : > { %v236_v15 = vsub.f32 0.0, %v235_v14 }
  0x72   : > { %298 = vadd.xlane.f32.xlu1 %v236_v15 }
  0xe4   : > { %v288_v16 = vpop.xlane.xlu1 %287 }
  0xe5   : > { %v289_v17 = vrot.slane %v288_v16, 4 }
  0xe6   : > { %v266_v18 = vpop.xlane.xlu0 %265 }
  0xe7   : > { %v290_v19 = vadd.f32 %v289_v17, %v288_v16  ;;  %v267_v20 = vrot.slane %v266_v18, 4 }
  0xe9   : > { %v268_v21 = vadd.f32 %v267_v20, %v266_v18  ;;  %v291_v22 = vrot.slane %v290_v19, 2 }
  0xea   : > { %v277_v23 = vpop.xlane.xlu0 %276 }
  0xeb   : > { %v269_v24 = vrot.slane %v268_v21, 2  ;;  %v278_v25 = vrot.slane %v277_v23, 4  ;;  %v292_v28 = vadd.f32 %v291_v22, %v290_v19 }
  0xed   : > { %v279_v26 = vadd.f32 %v278_v25, %v277_v23  ;;  %v270_v27 = vadd.f32 %v269_v24, %v268_v21  ;;  %v293_v33 = vrot.slane %v292_v28, 1 }
  0xef   : > { %v280_v29 = vrot.slane %v279_v26, 2  ;;  %v271_v30 = vrot.slane %v270_v27, 1  ;;  %v294_v36 = vadd.f32 %v293_v33, %v292_v28 }
  0xf1   : > { %v281_v31 = vadd.f32 %v280_v29, %v279_v26  ;;  %v272_v32 = vadd.f32 %v271_v30, %v270_v27 }
  0xf3   : > { %452 = vpush %v272_v32  ;;  %v282_v34 = vrot.slane %v281_v31, 1 }
  0xf5   : > { %v283_v35 = vadd.f32 %v282_v34, %v281_v31 }
  0xf7   : > { %454 = vpush %v283_v35 }
  0xf8   : > { %456 = vpush %v294_v36 }
  0xff   : > { %v299_v37 = vpop.xlane.xlu1 %298 }
 0x100   : > { %v300_v38 = vrot.slane %v299_v37, 4 }
 0x102   : > { %v301_v39 = vadd.f32 %v300_v38, %v299_v37 }
 0x104   : > { %v302_v40 = vrot.slane %v301_v39, 2 }
 0x106   : > { %v303_v41 = vadd.f32 %v302_v40, %v301_v39 }
 0x108   : > { %v304_v42 = vrot.slane %v303_v41, 1 }
 0x10a   : > { %v305_v43 = vadd.f32 %v304_v42, %v303_v41 }
 0x10c   : > { %458 = vpush %v305_v43 }
 0x124   : > { %s453_s21 = spop %452 }
 0x125   : > { %v274_v48 = vstv %s453_s21 }
 0x126   : > { %v309_v49 = vmul.f32 2.0, %v274_v48 }
 0x128   : > { %s455_s16 = spop %454  ;;  %v310_v50 = vadd.f32 1.0, %v309_v49 }
 0x129   : > { %v285_v44 = vstv %s455_s16  ;;  %s457_s19 = spop %456 }
 0x12a   : > { %v296_v45 = vstv %s457_s19 }
 0x12b   : > { %v308_v46 = vadd.f32 %v296_v45, %v285_v44 }
 0x12d   : > { %v311_v47 = vadd.f32 1.0, %v308_v46 }
 0x12f   : > { %531 = vrcp.f32 %v311_v47 }
 0x139   : > { %v532_v51 = vpop.eup %531 }
 0x13a   : > { %v313_v52 = vmul.f32 %v532_v51, %v310_v50 }
 0x13c   : > { %v314_v53 = vsub.f32 1.0, %v313_v52 }
 0x13d   : > { %s459_s30 = spop %458 }
 0x13e   : > { %v307_v54 = vstv %s459_s30  ;;  %v316_v56 = vmul.f32 0.5, %v314_v53 }
 0x13f   : > { %v315_v55 = vmul.f32 0.5, %v307_v54 }
 0x141   : > { %v317_v57 = vadd.f32 %v316_v56, %v315_v55 }
 0x143   : > { %318 = vst [vmem:[%s213_s27] sm:$0xff] %v317_v57 }
 0x144   : > { %606 = shalt.err (!%p603_p2)
}
 0x145   : > { %s607_s15 = scalar_lea.hbm %s875_s26, 128  ;;  %s611_s7 = scalar_lea.hbm %s926_s2, 256 }
 0x146   : > { %p608_p9 = scmp.ne.s32.totalorder %s875_s26, %s607_s15  ;;  %p612_p6 = scmp.lt.u32.totalorder %s875_s26, %s926_s2 }
 0x147   : > { %p613_p13 = scmp.lt.u32.totalorder %s611_s7, %s607_s15  ;;  %p615_p0 = scmp.lt.u32.totalorder %s607_s15, %s875_s26 }
 0x148   : > { %p609_p11 = pnand %p608_p9, %p939_p5 }
 0x149   : > { %p614_p8 = por %p613_p13, %p612_p6 }
 0x14a   : > { %p610_p3 = pneg %p609_p11 }
 0x14b   : > { %p616_p7 = por %p615_p0, %p614_p8 }
 0x14d   : > { %p617_p4 = pnand %p616_p7, %p610_p3 }
 0x14f   : > { %620 = shalt.err (!%p617_p4)
}
 0x150   : > { %464 = dma.vmem_to_hbm [thread:$0]  (%p939_p5), %s877_s28, 128, %s875_s26, %s320_s3  }
 0x151 PF: > { %s345_s19 = sand.u32 1, %s659_s9   ;;  %p940_p10 = scmp.ne.s32.totalorder %s932_s24, 0 }
 0x152   : > { %p941_p12 = scmp.ge.s32.totalorder %s679_s14, 2  ;;  %s346_s30 = scalar_lea.sflag [#allocation5], %s345_s19 }
 0x154   : > { %p474_p1 = pnand %p941_p12, %p940_p10 }
 0x156   : > { %654 = dma.done.wait (!%p474_p1), %s346_s30, 128  }
 0x157   : > { %656 = vsyncadd (!%p474_p1), %s346_s30, 4294967168  ;;  %s21_s14 = sadd.s32 1, %s679_s14   ;;  %s942_s9 = smov %s663_s10 }
 0x158   : > { %p18_p2 = scmp.ge.s32.totalorder %s21_s14, 4   ;;  %s943_s10 = smov %s667_s11 }
 0x159   : > { %s944_s11 = smov %s755_s23  ;;  %s945_s12 = smov %s675_s13 }
 0x15a   : > { %s946_s13 = smov %s948_s17  ;;  %20 = sbr.rel (!%p18_p2) target bundleno = 8 (0x8), region = 97 }
 0x161   :  { %351 = vsyncpa [#allocation4], 1 }
 0x162   :  { %353 = vsyncpa [#allocation4 + $0x1], 1 }
 0x163   :  { %354 = vsyncpa [#allocation7], 1 }
 0x164   :  { %356 = vsyncpa [#allocation7 + $0x1], 1 }
 0x165   :  { %357 = vsyncpa [#allocation5], 1 }
 0x166   :  { %359 = vsyncpa [#allocation5 + $0x1], 1 }

</bundles_post_ra>
